<compile_context>
chip_gen: v7x
topology: tpu7x:2x2x1
jax: 0.10.0
libtpu: 0.0.40
codegen_flags: <defaults>
</compile_context>

<pallas_src>
import jax
import jax.numpy as jnp
from jax import lax
from jax.experimental import pallas as pl
from jax.experimental.pallas import tpu as pltpu


def _stats_kernel(x_ref, sumx_ref, xxt_ref):
    """Accumulate per-(group, batch) sum(x) and x @ x^T over spatial tiles.

    x_ref   : (1, 1, nc, thw)  input chunk (original dtype)
    sumx_ref: (1, 1, nc, 1)    f32 accumulator (resident across t axis)
    xxt_ref : (1, 1, nc, nc)   f32 accumulator (resident across t axis)
    """
    t = pl.program_id(2)

    @pl.when(t == 0)
    def _init():
        sumx_ref[...] = jnp.zeros_like(sumx_ref)
        xxt_ref[...] = jnp.zeros_like(xxt_ref)

    x = x_ref[0, 0]                                        # (nc, thw)
    xf = x.astype(jnp.float32)
    sumx_ref[0, 0] += jnp.sum(xf, axis=-1, keepdims=True)  # (nc, 1)
    # x @ x^T, contract over the lane (spatial) axis; MXU with f32 accumulate.
    xxt_ref[0, 0] += lax.dot_general(
        x, x, (((1,), (1,)), ((), ())),
        preferred_element_type=jnp.float32)


def _apply_kernel(x_ref, m_ref, b_ref, out_ref):
    """out = M @ x - bias  for one (group, batch, spatial-tile) chunk.

    x_ref  : (1, 1, nc, thw)   input chunk
    m_ref  : (1, nc, nc)       fused rotation*whitening matrix (f32)
    b_ref  : (1, nc, 1)        fused bias = M @ mean (f32)
    out_ref: (1, 1, nc, thw)   output chunk (lane-dense)
    """
    x = x_ref[0, 0].astype(jnp.float32)                    # (nc, thw)
    mm = m_ref[0]                                          # (nc, nc)
    bb = b_ref[0]                                          # (nc, 1)
    # nc is tiny; the matmul is negligible next to the HBM stream.
    y = jnp.dot(mm, x, preferred_element_type=jnp.float32) - bb
    out_ref[0, 0] = y.astype(out_ref.dtype)


def iter_norm_rotation_forward(X, running_rot, running_mean, running_wm, *,
                               num_channels, T=10, eps=1e-5, momentum=0.05,
                               training=True, lane_tile=4096):
    """Forward of IterNormRotation (mode=-1, affine=False).

    Returns (Xn, new_running_mean, new_running_wm); in eval mode the running
    buffers are returned unchanged.
    """
    B, C, H, W = X.shape
    nc = num_channels
    g = C // nc
    assert g * nc == C
    HW = H * W
    m = B * HW

    # Free reshape (no HBM transpose): NCHW -> (B, g, nc, HW).
    x4 = X.reshape(B, g, nc, HW)

    # Spatial/lane tiling: one tile if small, else 128-aligned chunks.
    if HW <= lane_tile:
        thw = HW
        hw_pad = HW
    else:
        thw = lane_tile
        hw_pad = pl.cdiv(HW, thw) * thw
    if hw_pad != HW:
        # Zero padding is exact: zeros contribute nothing to sum / x@x^T and the
        # padded output columns are sliced off below.
        x4 = jnp.pad(x4, ((0, 0), (0, 0), (0, 0), (0, hw_pad - HW)))
    n_t = hw_pad // thw

    # Explicit VMEM budget from the chosen tiles (padded sublanes, f32 worst
    # case, double-buffered in+out, plus headroom). Tiny vs. any chip's VMEM.
    itemsize = max(jnp.dtype(X.dtype).itemsize, 4)
    blk_bytes = (-(-nc // 8) * 8) * thw * itemsize
    vmem_limit = int(min(64 << 20, max(4 << 20, 8 * blk_bytes)))

    if training:
        sumx_p, xxt_p = pl.pallas_call(
            _stats_kernel,
            out_shape=(jax.ShapeDtypeStruct((g, B, nc, 1), jnp.float32),
                       jax.ShapeDtypeStruct((g, B, nc, nc), jnp.float32)),
            grid_spec=pltpu.PrefetchScalarGridSpec(
                num_scalar_prefetch=0,
                grid=(g, B, n_t),
                in_specs=[
                    pl.BlockSpec((1, 1, nc, thw),
                                 lambda gi, b, t: (b, gi, 0, t)),
                ],
                out_specs=(
                    pl.BlockSpec((1, 1, nc, 1),
                                 lambda gi, b, t: (gi, b, 0, 0)),
                    pl.BlockSpec((1, 1, nc, nc),
                                 lambda gi, b, t: (gi, b, 0, 0)),
                )),
            compiler_params=pltpu.CompilerParams(
                dimension_semantics=("parallel", "parallel", "arbitrary"),
                vmem_limit_bytes=vmem_limit),
        )(x4)

        # --- tiny per-group math, batched over g in plain XLA ---------------
        sum_x = jnp.sum(sumx_p, axis=1)                    # (g, nc, 1)
        xxt = jnp.sum(xxt_p, axis=1)                       # (g, nc, nc)
        mean = sum_x / m                                   # (g, nc, 1)
        eye = jnp.eye(nc, dtype=jnp.float32)[None]         # (1, nc, nc)
        sigma = eps * eye + xxt / m - mean @ jnp.swapaxes(mean, 1, 2)
        rTr = 1.0 / jnp.sum(sigma * eye, axis=(1, 2), keepdims=True)
        sigma_n = sigma * rTr
        P = jnp.broadcast_to(eye, (g, nc, nc))
        for _ in range(T):                                 # Newton-Schulz
            P3 = P @ P @ P
            P = 1.5 * P - 0.5 * (P3 @ sigma_n)
        wm = P * jnp.sqrt(rTr)                             # (g, nc, nc)

        new_running_mean = momentum * mean + (1.0 - momentum) * running_mean
        new_running_wm = momentum * wm + (1.0 - momentum) * running_wm
    else:
        mean = running_mean.astype(jnp.float32)
        wm = running_wm.astype(jnp.float32)
        new_running_mean = running_mean
        new_running_wm = running_wm

    # Fuse rotation with whitening: out = R @ wm @ (x - mean) = M @ x - bias.
    M = jnp.matmul(running_rot.astype(jnp.float32), wm)    # (g, nc, nc)
    bias = jnp.matmul(M, mean)                             # (g, nc, 1)

    out4 = pl.pallas_call(
        _apply_kernel,
        out_shape=jax.ShapeDtypeStruct((B, g, nc, hw_pad), X.dtype),
        grid_spec=pltpu.PrefetchScalarGridSpec(
            num_scalar_prefetch=0,
            grid=(g, B, n_t),
            in_specs=[
                pl.BlockSpec((1, 1, nc, thw), lambda gi, b, t: (b, gi, 0, t)),
                pl.BlockSpec((1, nc, nc), lambda gi, b, t: (gi, 0, 0)),
                pl.BlockSpec((1, nc, 1), lambda gi, b, t: (gi, 0, 0)),
            ],
            out_specs=pl.BlockSpec((1, 1, nc, thw),
                                   lambda gi, b, t: (b, gi, 0, t))),
        compiler_params=pltpu.CompilerParams(
            dimension_semantics=("parallel", "parallel", "parallel"),
            vmem_limit_bytes=vmem_limit),
    )(x4, M, bias)

    if hw_pad != HW:
        out4 = out4[..., :HW]
    Xn = out4.reshape(B, C, H, W)
    return Xn, new_running_mean, new_running_wm


def _reference(X, running_rot, *, num_channels, T=10, eps=1e-5):
    """Pure-JAX reference mirroring the PyTorch code line-by-line."""
    B, C, H, W = X.shape
    nc = num_channels
    g = C // nc
    m = B * H * W
    x = jnp.transpose(X, (1, 0, 2, 3)).reshape(g, nc, m).astype(jnp.float32)
    mean = x.mean(-1, keepdims=True)
    xc = x - mean
    eye = jnp.broadcast_to(jnp.eye(nc, dtype=jnp.float32), (g, nc, nc))
    sigma = eps * eye + jnp.einsum('gim,gjm->gij', xc, xc) / m
    rTr = 1.0 / jnp.sum(sigma * eye, axis=(1, 2), keepdims=True)
    sigma_n = sigma * rTr
    P = eye
    for _ in range(T):
        P3 = P @ P @ P
        P = 1.5 * P - 0.5 * (P3 @ sigma_n)
    wm = P * jnp.sqrt(rTr)
    xn = wm @ xc
    xn = jnp.einsum('gdc,gcm->gdm', running_rot.astype(jnp.float32), xn)
    return xn.reshape(C, B, H, W).transpose(1, 0, 2, 3).astype(X.dtype)


if __name__ == "__main__":
    # Module config: num_features=4, num_groups=1 -> num_channels=4, T=10,
    # eps=1e-5, momentum=0.05, affine=False, mode=-1.
    num_features = 4
    num_channels = 4
    num_groups = num_features // num_channels
    T = 10
    eps = 1e-5
    momentum = 0.05

    # Buffers exactly as registered in __init__.
    running_rot = jnp.broadcast_to(
        jnp.eye(num_channels, dtype=jnp.float32),
        (num_groups, num_channels, num_channels)).copy()
    running_wm = running_rot.copy()
    running_mean = jnp.zeros((num_groups, num_channels, 1), dtype=jnp.float32)

    key = jax.random.PRNGKey(0)
    X = jax.random.normal(key, (2, num_features, 16, 16), dtype=jnp.float32)

    out, new_rm, new_rwm = iter_norm_rotation_forward(
        X, running_rot, running_mean, running_wm,
        num_channels=num_channels, T=T, eps=eps, momentum=momentum,
        training=True)
    out = jax.block_until_ready(out)
    jax.block_until_ready((new_rm, new_rwm))

    ref = _reference(X, running_rot, num_channels=num_channels, T=T, eps=eps)
    assert out.shape == X.shape
    assert jnp.allclose(out, ref, atol=1e-4, rtol=1e-4), (
        float(jnp.max(jnp.abs(out - ref))))

    print("KERNEL_OK")
</pallas_src>

<mosaic_0001>
module attributes {stable_mosaic.version = 11 : i64} {
  func.func @_stats_kernel(%arg0: i32, %arg1: i32, %arg2: i32, %arg3: memref<1x1x4x256xf32, #tpu.memory_space<vmem>>, %arg4: memref<1x1x4x1xf32, #tpu.memory_space<vmem>>, %arg5: memref<1x1x4x4xf32, #tpu.memory_space<vmem>>) attributes {dimension_semantics = [#tpu.dimension_semantics<parallel>, #tpu.dimension_semantics<parallel>, #tpu.dimension_semantics<arbitrary>], iteration_bounds = array<i64: 1, 2, 1>, scalar_prefetch = 0 : i64, scratch_operands = 0 : i64, tpu.core_type = #tpu.core_type<tc>, window_params = [{transform_indices = @transform_0, window_bounds = array<i64: 1, 1, 4, 256>}, {transform_indices = @transform_1, window_bounds = array<i64: 1, 1, 4, 1>}, {transform_indices = @transform_2, window_bounds = array<i64: 1, 1, 4, 4>}]} {
    %c0_i32 = arith.constant 0 : i32
    %0 = arith.cmpi eq, %arg2, %c0_i32 : i32
    %1 = arith.extui %0 : i1 to i32
    %c0_i32_0 = arith.constant 0 : i32
    %2 = arith.cmpi ne, %1, %c0_i32_0 : i32
    scf.if %2 {
      %cst_21 = arith.constant 0.000000e+00 : f32
      %20 = vector.broadcast %cst_21 : f32 to vector<1x1x4x1xf32>
      %c0_22 = arith.constant 0 : index
      %c0_23 = arith.constant 0 : index
      %c0_24 = arith.constant 0 : index
      %c0_25 = arith.constant 0 : index
      %21 = vector.load %arg4[%c0_22, %c0_23, %c0_24, %c0_25] : memref<1x1x4x1xf32, #tpu.memory_space<vmem>>, vector<1x1x4x1xf32>
      tpu.vector_store %arg4[%c0_22, %c0_23, %c0_24, %c0_25], %20 {strides = array<i32>} : memref<1x1x4x1xf32, #tpu.memory_space<vmem>>, vector<1x1x4x1xf32>,
      %cst_26 = arith.constant 0.000000e+00 : f32
      %22 = vector.broadcast %cst_26 : f32 to vector<1x1x4x4xf32>
      %c0_27 = arith.constant 0 : index
      %c0_28 = arith.constant 0 : index
      %c0_29 = arith.constant 0 : index
      %c0_30 = arith.constant 0 : index
      %23 = vector.load %arg5[%c0_27, %c0_28, %c0_29, %c0_30] : memref<1x1x4x4xf32, #tpu.memory_space<vmem>>, vector<1x1x4x4xf32>
      tpu.vector_store %arg5[%c0_27, %c0_28, %c0_29, %c0_30], %22 {strides = array<i32>} : memref<1x1x4x4xf32, #tpu.memory_space<vmem>>, vector<1x1x4x4xf32>,
    } else {
    }
    %c0 = arith.constant 0 : index
    %c0_1 = arith.constant 0 : index
    %c0_2 = arith.constant 0 : index
    %c0_3 = arith.constant 0 : index
    %3 = vector.load %arg3[%c0, %c0_1, %c0_2, %c0_3] : memref<1x1x4x256xf32, #tpu.memory_space<vmem>>, vector<1x1x4x256xf32>
    %4 = vector.shape_cast %3 : vector<1x1x4x256xf32> to vector<4x256xf32>
    %c0_4 = arith.constant 0 : index
    %c0_5 = arith.constant 0 : index
    %c0_6 = arith.constant 0 : index
    %c0_7 = arith.constant 0 : index
    %5 = vector.load %arg4[%c0_4, %c0_5, %c0_6, %c0_7] : memref<1x1x4x1xf32, #tpu.memory_space<vmem>>, vector<1x1x4x1xf32>
    %6 = vector.shape_cast %5 : vector<1x1x4x1xf32> to vector<4x1xf32>
    %cst = arith.constant dense<0.000000e+00> : vector<4xf32>
    %7 = vector.multi_reduction <add>, %4, %cst [1] : vector<4x256xf32> to vector<4xf32>
    %8 = vector.shape_cast %7 : vector<4xf32> to vector<4x1xf32>
    %9 = arith.addf %6, %8 : vector<4x1xf32>
    %c0_8 = arith.constant 0 : index
    %c0_9 = arith.constant 0 : index
    %c0_10 = arith.constant 0 : index
    %c0_11 = arith.constant 0 : index
    %10 = vector.load %arg4[%c0_8, %c0_9, %c0_10, %c0_11] : memref<1x1x4x1xf32, #tpu.memory_space<vmem>>, vector<1x1x4x1xf32>
    %11 = vector.shape_cast %10 : vector<1x1x4x1xf32> to vector<4x1xf32>
    %12 = vector.shape_cast %9 : vector<4x1xf32> to vector<1x1x4x1xf32>
    tpu.vector_store %arg4[%c0_8, %c0_9, %c0_10, %c0_11], %12 {strides = array<i32>} : memref<1x1x4x1xf32, #tpu.memory_space<vmem>>, vector<1x1x4x1xf32>,
    %c0_12 = arith.constant 0 : index
    %c0_13 = arith.constant 0 : index
    %c0_14 = arith.constant 0 : index
    %c0_15 = arith.constant 0 : index
    %13 = vector.load %arg5[%c0_12, %c0_13, %c0_14, %c0_15] : memref<1x1x4x4xf32, #tpu.memory_space<vmem>>, vector<1x1x4x4xf32>
    %14 = vector.shape_cast %13 : vector<1x1x4x4xf32> to vector<4x4xf32>
    %cst_16 = arith.constant dense<0.000000e+00> : vector<4x4xf32>
    %15 = tpu.matmul %4, %4, %cst_16 {dimension_numbers = #tpu.dot_dimension_numbers<[1], [1], [0], [0], [0, 0, 1, 0], [], []>} : vector<4x256xf32>, vector<4x256xf32>, vector<4x4xf32> -> vector<4x4xf32>
    %16 = arith.addf %14, %15 : vector<4x4xf32>
    %c0_17 = arith.constant 0 : index
    %c0_18 = arith.constant 0 : index
    %c0_19 = arith.constant 0 : index
    %c0_20 = arith.constant 0 : index
    %17 = vector.load %arg5[%c0_17, %c0_18, %c0_19, %c0_20] : memref<1x1x4x4xf32, #tpu.memory_space<vmem>>, vector<1x1x4x4xf32>
    %18 = vector.shape_cast %17 : vector<1x1x4x4xf32> to vector<4x4xf32>
    %19 = vector.shape_cast %16 : vector<4x4xf32> to vector<1x1x4x4xf32>
    tpu.vector_store %arg5[%c0_17, %c0_18, %c0_19, %c0_20], %19 {strides = array<i32>} : memref<1x1x4x4xf32, #tpu.memory_space<vmem>>, vector<1x1x4x4xf32>,
    return
  }
  func.func @transform_0(%arg0: i32, %arg1: i32, %arg2: i32) -> (i32, i32, i32, i32) {
    %c0_i32 = arith.constant 0 : i32
    %c0_i32_0 = arith.constant 0 : i32
    return %arg1, %arg0, %c0_i32, %arg2 : i32, i32, i32, i32
  }
  func.func @transform_1(%arg0: i32, %arg1: i32, %arg2: i32) -> (i32, i32, i32, i32) {
    %c0_i32 = arith.constant 0 : i32
    %c0_i32_0 = arith.constant 0 : i32
    %c0_i32_1 = arith.constant 0 : i32
    return %arg0, %arg1, %c0_i32, %c0_i32_0 : i32, i32, i32, i32
  }
  func.func @transform_2(%arg0: i32, %arg1: i32, %arg2: i32) -> (i32, i32, i32, i32) {
    %c0_i32 = arith.constant 0 : i32
    %c0_i32_0 = arith.constant 0 : i32
    %c0_i32_1 = arith.constant 0 : i32
    return %arg0, %arg1, %c0_i32, %c0_i32_0 : i32, i32, i32, i32
  }
}

</mosaic_0001>

<bundles_post_ra>
// kernel: tpu_custom_call.1
= control target key start
LH: loop header
LB: loop body
LE: loop exit
PB: predicated region body
PF: predicated region fallthrough
CT: control target
= control target key end

     0   :  { %8 = vsyncpa [#allocation3], 0  ;;  %s856_s0 = inlined_call_operand.hbm [shape: f32[2,1,4,256], index: 0, kind: input, shape index: {}]   ;;  %s857_s1 = inlined_call_operand.vmem [shape: f32[1,2,4,1], index: 1, kind: output, shape index: {0}]   ;;  %s858_s2 = inlined_call_operand.hbm [shape: f32[1,2,4,4], index: 2, kind: output, shape index: {1}]  }
   0x1   :  { %10 = vsyncpa [#allocation3 + $0x1], 0 }
   0x2   :  { %11 = vsyncpa [#allocation4], 0 }
   0x3   :  { %13 = vsyncpa [#allocation4 + $0x1], 0  ;;  %s670_s9 = smov 0   ;;  %s672_s10 = smov 0  }
   0x4   :  { %s674_s11 = smov 0   ;;  %s676_s12 = smov 0  }
   0x5   :  { %s678_s13 = smov 0   ;;  %s680_s14 = smov 0  }
   0x6 LB: > { %s458_s15 = sadd.s32 4294967295, %s650_s14   ;;  %s459_s16 = sadd.s32 4294967294, %s650_s14   ;;  %s650_s14 = sphi %s680_s14, %s19_s14   ;;  %s646_s13 = sphi %s678_s13, %s874_s13   ;;  %s642_s12 = sphi %s676_s12, %s873_s12   ;;  %s638_s11 = sphi %s674_s11, %s872_s11   ;;  %s634_s10 = sphi %s672_s10, %s871_s10   ;;  %s630_s9 = sphi %s670_s9, %s870_s9  }
   0x7   : > { %s34_s17 = sadd.s32 1, %s646_s13  ;;  %s49_s18 = sadd.s32 1, %s638_s11 }
   0x8   : > { %p36_p0 = scmp.ge.s32.totalorder %s34_s17, 2  ;;  %p56_p1 = scmp.ne.s32.totalorder %s638_s11, %s634_s10 }
   0x9   : > { %p57_p2 = scmp.eq.s32.totalorder %s650_s14, 0  ;;  %p62_p3 = scmp.ne.s32.totalorder %s634_s10, %s630_s9 }
   0xa   : > { %s876_s17 = smov (%p36_p0, %s34_s17), 0  ;;  %p63_p5 = scmp.eq.s32.totalorder %s458_s15, 0 }
   0xb   : > { %p711_p4 = por %p57_p2, %p56_p1  ;;  %s42_s20 = ssub.s32 %s646_s13, %s876_s17 }
   0xc   : > { %p116_p6 = scmp.eq.s32.totalorder %s458_s15, 1  ;;  %p47_p7 = scmp.eq.s32.totalorder %s42_s20, 0 }
   0xd   : > { %p717_p8 = por %p63_p5, %p62_p3  ;;  %p122_p10 = scmp.eq.s32.totalorder %s459_s16, 1 }
   0xe   : > { %p721_p9 = por %p116_p6, %p56_p1  ;;  %p486_p13 = scmp.lt.s32.totalorder %s650_s14, 2 }
   0xf   : > { %s726_s23 = scalar_select %p47_p7, %s638_s11, %s49_s18  }
  0x10   : > { %s862_s22 = scalar_select %p721_p9, 1, 0 }
  0x11   : > { %p728_p11 = por %p122_p10, %p62_p3  ;;  %s142_s25 = sand.u32 1, %s638_s11  }
  0x12   : > { %s462_s26 = sshll.u32 %s142_s25, 3  ;;  %s473_s27 = sshll.u32 %s646_s13, 7 }
  0x13   : > { %s863_s24 = scalar_select %p728_p11, 1, 0 }
  0x14   : > { %s739_s30 = scalar_lea.hbm %s856_s0, %s473_s27  ;;  %s146_s3 = scalar_lea.vmem [#allocation2], %s462_s26 }
  0x15   : > { %s158_s4 = sshll.u32 %s146_s3, 4  ;;  %p745_p0 = pnand %p486_p13, %p711_p4  ;;  %s741_s4 = int_to_ptr.vmem [resolvable:$true] %s158_s4 }
  0x16   : > { %s143_s6 = scalar_lea.sflag [#allocation3], %s142_s25  ;;  %s538_s7 = scalar_lea.hbm %s739_s30, 128 }
  0x17   : > { %p539_p3 = scmp.ne.s32.totalorder %s739_s30, %s538_s7  ;;  %p540_p5 = pneg %p745_p0 }
  0x18   : > { %s543_s16 = scalar_lea.hbm %s856_s0, 256  ;;  %p544_p4 = scmp.lt.u32.totalorder %s739_s30, %s856_s0 }
  0x19   : > { %p541_p6 = pnand %p540_p5, %p539_p3  ;;  %p545_p10 = scmp.lt.u32.totalorder %s543_s16, %s538_s7 }
  0x1a   : > { %p547_p12 = scmp.lt.u32.totalorder %s538_s7, %s739_s30 }
  0x1b   : > { %p542_p7 = pneg %p541_p6  ;;  %p546_p13 = por %p545_p10, %p544_p4 }
  0x1d   : > { %p548_p1 = por %p547_p12, %p546_p13 }
  0x1f   : > { %p549_p2 = pnand %p548_p1, %p542_p7 }
  0x21   : > { %552 = shalt.err (!%p549_p2)
}
  0x22   : > { %s553_s20 = scalar_lea.vmem %s741_s4, 128  ;;  %s652_s25 = smov [#allocation2]  }
  0x23   : > { %p554_p3 = scmp.ne.s32.totalorder %s741_s4, %s553_s20  ;;  %s558_s26 = sshll.u32 %s652_s25, 4  ;;  %s559_s26 = int_to_ptr.vmem [resolvable:$false] %s558_s26 }
  0x24   : > { %s560_s27 = scalar_lea.vmem %s559_s26, 256  ;;  %p561_p9 = scmp.lt.s32.totalorder %s741_s4, %s559_s26 }
  0x25   : > { %p556_p6 = pnand %p554_p3, %p540_p5  ;;  %p562_p4 = scmp.lt.s32.totalorder %s560_s27, %s553_s20 }
  0x27   : > { %p557_p11 = pneg %p556_p6  ;;  %p563_p10 = por %p562_p4, %p561_p9 }
  0x29   : > { %p564_p12 = pnand %p563_p10, %p557_p11 }
  0x2b   : > { %567 = shalt.err (!%p564_p12)
}
  0x2c   : > { %481 = dma.hbm_to_vmem [thread:$0]  (!%p745_p0), %s739_s30, 128, %s741_s4, %s143_s6  }
  0x2d   : > { %p865_p1 = scmp.lt.s32.totalorder %s650_s14, 3  ;;  %p866_p2 = scmp.ge.s32.totalorder %s650_s14, 1 }
  0x2f   : > { %p164_p5 = pnand %p866_p2, %p865_p1 }
  0x30   : > { %s781_s28 = sand.u32 (!%p164_p5), 1, %s634_s10  }
  0x31   : > { %167 = sbr.rel (%p164_p5) target bundleno = 292 (0x124), region = 24  ;;  %s466_s29 = sshll.u32 (!%p164_p5), %s781_s28, 3 }
  0x32   : > { %s170_s3 = scalar_lea.sflag (!%p164_p5), [#allocation3], %s781_s28  ;;  %s173_s7 = scalar_lea.vmem (!%p164_p5), [#allocation2], %s466_s29 }
  0x38   : > { %621 = dma.done.wait (%p717_p8), %s170_s3, 128  }
  0x39   : > { %623 = vsyncadd (%p717_p8), %s170_s3, 4294967168  ;;  %s467_s30 = sshll.u32 %s781_s28, 2  ;;  %vm217_vm0 = vcmask 27648   ;;  %v653_v0 = vmov 0.0   ;;  %vm224_vm1 = vcmask 1043456   ;;  %v219_v1 = vld [vmem:[%s173_s7] sm:$0xff] }
  0x3a   : > { %s790_s4 = scalar_lea.vmem [#allocation5], %s467_s30  ;;  %v222_v2 = vcombine.high %v219_v1, %v219_v1  ;;  %v225_v3 = vsel %vm224_vm1, %v219_v1, 0.0  ;;  %p205_p8 = scmp.lt.s32.totalorder %s642_s12, 1  ;;  %vm215_vm2 = vcmask 3072  }
  0x3b   : > { %218 = vst.msk [vmem:[%s790_s4] sm:$0xf] %vm217_vm0, %v653_v0  ;;  %s470_s16 = sshll.u32 %s642_s12, 6  ;;  %s334_s18 = sshll.u32 %s790_s4, 4  ;;  %s807_s18 = int_to_ptr.vmem [resolvable:$true] %s334_s18 }
  0x3c   : > { %234 = vmatprep.subr.mxu0 %v222_v2  ;;  %298 = vmatprep.mubr.f32.mxu0 %v222_v2  ;;  %v226_v4 = vsel %vm224_vm1, %v222_v2, 0.0  ;;  %s206_s21 = scalar_select %p205_p8, %s642_s12, 1 }
  0x3d   : > { %235 = vmatpush1.xpose.msra.mxu0 %v219_v1  ;;  %v227_v5 = vadd.f32 %v226_v4, %v225_v3  ;;  %s805_s25 = scalar_lea.hbm %s858_s2, %s470_s16  ;;  %s316_s26 = scalar_lea.sflag [#allocation4], %s781_s28 }
  0x3e   : > { %s468_s5 = sshll.u32 %s206_s21, 2  ;;  %s568_s27 = scalar_lea.vmem %s807_s18, 64 }
  0x3f   : > { %228 = vadd.xlane.f32.xlu0 %v227_v5  ;;  %s210_s15 = scalar_lea.vmem %s857_s1, %s468_s5  ;;  %p569_p9 = scmp.ne.s32.totalorder %s807_s18, %s568_s27 }
  0x40   : > { %299 = vmatmul.mubr.f32.vlgmr.msra.gmra.mrb[0].mxu0 %v219_v1  ;;  %216 = vst.msk [vmem:[%s210_s15] sm:$0xf] %vm215_vm2, %v653_v0  ;;  %p867_p11 = scmp.ne.s32.totalorder %s862_s22, 0  ;;  %s654_s12 = smov [#allocation5]  }
  0x41   : > { %s572_s29 = sshll.u32 %s654_s12, 4  ;;  %s573_s29 = int_to_ptr.vmem [resolvable:$false] %s572_s29 }
  0x42   : > { %v233_v9 = vld [vmem:[%s790_s4] sm:$0xf]  ;;  %p570_p0 = pnand %p569_p9, %p867_p11  ;;  %s574_s3 = scalar_lea.vmem %s573_s29, 128 }
  0x43   : > { %p575_p13 = scmp.lt.s32.totalorder %s807_s18, %s573_s29  ;;  %p576_p3 = scmp.lt.s32.totalorder %s574_s3, %s568_s27 }
  0x44   : > { %p571_p7 = pneg %p570_p0 }
  0x45   : > { %p577_p6 = por %p576_p3, %p575_p13 }
  0x47   : > { %v220_v6 = vld [vmem:[%s210_s15] sm:$0xf]  ;;  %p578_p4 = pnand %p577_p6, %p571_p7 }
  0xcc   : > { %v229_v7 = vpop.xlane.xlu0 %228 }
  0xcd   : > { %v230_v8 = vadd.f32 %v229_v7, %v220_v6 }
  0xcf   : > { %232 = vst.msk [vmem:[%s210_s15] sm:$0xf] %vm215_vm2, %v230_v8 }
 0x113   : > { %v300_v10 = vpop.f32.mrb[0].mxu0 }
 0x114   : > { %v304_v11 = vadd.f32 %v300_v10, %v233_v9  ;;  %v302_v12 = vpop.f32.mrb[1].mxu0 }
 0x116   : > { %306 = vst.msk [vmem:[%s790_s4] sm:$0xf] %vm217_vm0, %v304_v11 }
 0x117   : > { %581 = shalt.err (!%p578_p4)
}
 0x118   : > { %s582_s28 = scalar_lea.hbm %s805_s25, 64  ;;  %s586_s4 = scalar_lea.hbm %s858_s2, 128 }
 0x119   : > { %p583_p10 = scmp.ne.s32.totalorder %s805_s25, %s582_s28  ;;  %p587_p2 = scmp.lt.u32.totalorder %s805_s25, %s858_s2 }
 0x11a   : > { %p588_p5 = scmp.lt.u32.totalorder %s586_s4, %s582_s28  ;;  %p590_p9 = scmp.lt.u32.totalorder %s582_s28, %s805_s25 }
 0x11b   : > { %p584_p12 = pnand %p583_p10, %p867_p11 }
 0x11c   : > { %p589_p8 = por %p588_p5, %p587_p2 }
 0x11d   : > { %p585_p1 = pneg %p584_p12 }
 0x11e   : > { %p591_p0 = por %p590_p9, %p589_p8 }
 0x120   : > { %p592_p7 = pnand %p591_p0, %p585_p1 }
 0x122   : > { %595 = shalt.err (!%p592_p7)
}
 0x123   : > { %476 = dma.vmem_to_hbm [thread:$0]  (%p867_p11), %s807_s18, 64, %s805_s25, %s316_s26  }
 0x124 PF: > { %s357_s6 = sand.u32 1, %s630_s9   ;;  %p868_p13 = scmp.ne.s32.totalorder %s863_s24, 0 }
 0x125   : > { %p869_p3 = scmp.ge.s32.totalorder %s650_s14, 2  ;;  %s358_s8 = scalar_lea.sflag [#allocation4], %s357_s6 }
 0x127   : > { %p483_p6 = pnand %p869_p3, %p868_p13 }
 0x129   : > { %625 = dma.done.wait (!%p483_p6), %s358_s8, 64  }
 0x12a   : > { %627 = vsyncadd (!%p483_p6), %s358_s8, 4294967232  ;;  %s19_s14 = sadd.s32 1, %s650_s14   ;;  %s870_s9 = smov %s634_s10 }
 0x12b   : > { %p16_p4 = scmp.ge.s32.totalorder %s19_s14, 4   ;;  %s871_s10 = smov %s638_s11 }
 0x12c   : > { %s872_s11 = smov %s726_s23  ;;  %s873_s12 = smov %s646_s13 }
 0x12d   : > { %s874_s13 = smov %s876_s17  ;;  %18 = sbr.rel (!%p16_p4) target bundleno = 6 (0x6), region = 85 }
 0x134   :  { %363 = vsyncpa [#allocation3], 1 }
 0x135   :  { %365 = vsyncpa [#allocation3 + $0x1], 1 }
 0x136   :  { %366 = vsyncpa [#allocation4], 1 }
 0x137   :  { %368 = vsyncpa [#allocation4 + $0x1], 1 }

</bundles_post_ra>
